<compile_context>
chip_gen: v7x
topology: tpu7x:2x2x1
jax: 0.10.0
libtpu: 0.0.40
codegen_flags: <defaults>
</compile_context>

<pallas_src>
import jax
import jax.numpy as jnp
from jax.experimental import pallas as pl
from jax.experimental.pallas import tpu as pltpu

LANES = 128
SUBLANES = 8
BLOCK_BYTES = 2 * 1024 * 1024  # 2 MiB per input block (per perf review)


def _round_down(x, m):
    return (x // m) * m


def _make_kernel(tile_m, rows_valid, needs_mask):
    def kernel(out_ref, tgt_ref, q_ref, loss_ref, acc_pos_ref, acc_sum_ref):
        i = pl.program_id(0)

        @pl.when(i == 0)
        def _init():
            acc_pos_ref[...] = jnp.zeros_like(acc_pos_ref)
            acc_sum_ref[...] = jnp.zeros_like(acc_sum_ref)

        res = out_ref[...].astype(jnp.float32) - tgt_ref[...].astype(jnp.float32)

        if needs_mask:
            # Only the last block overhangs the array; rows past `rows_valid`
            # hold unspecified (stale) data, so zero them (contribute exactly 0).
            row_ids = i * tile_m + jax.lax.broadcasted_iota(
                jnp.int32, (tile_m, LANES), 0)
            res = jnp.where(row_ids < rows_valid, res, 0.0)

        pos = jnp.maximum(res, 0.0)

        # Fold (tile_m, 128) -> (tile_m//8, 8, 128) and reduce the leading axis:
        # pure vreg-wise VPU adds that co-issue with the input DMAs.
        folds = tile_m // SUBLANES
        acc_pos_ref[...] += jnp.sum(pos.reshape(folds, SUBLANES, LANES), axis=0)
        acc_sum_ref[...] += jnp.sum(res.reshape(folds, SUBLANES, LANES), axis=0)

        # Epilogue: one-shot cross-lane reduce (XLU slot is idle) + q-combine,
        # written as a single SMEM scalar -> no host-side reduce needed.
        @pl.when(i == pl.num_programs(0) - 1)
        def _finalize():
            q = q_ref[0]
            loss_ref[0] = jnp.sum(acc_pos_ref[...]) - q * jnp.sum(acc_sum_ref[...])

    return kernel


def _jnp_loss_terms(o, t):
    res = o.astype(jnp.float32) - t.astype(jnp.float32)
    return jnp.sum(jnp.maximum(res, 0.0)), jnp.sum(res)


def custom_loss(output, target, q):
    """Pallas TPU implementation of CustomLoss(q).forward(output, target)."""
    assert output.shape == target.shape

    o = jnp.ravel(output)
    t = jnp.ravel(target)
    n = o.shape[0]
    q_f32 = jnp.asarray(q, dtype=jnp.float32)

    # Elements that do not fill a whole 128-lane row are folded in with plain
    # jnp (at most 127 of them) -- avoids any jnp.pad copy of the full inputs.
    rem = n % LANES
    bulk = n - rem
    rows_valid = bulk // LANES

    itemsize = max(jnp.dtype(o.dtype).itemsize, jnp.dtype(t.dtype).itemsize)
    sub_mult = max(SUBLANES, 32 // itemsize)  # (8,128) f32 / (16,128) bf16 / (32,128) int8

    tail_loss = jnp.float32(0.0)
    if rem:
        p, s = _jnp_loss_terms(o[bulk:], t[bulk:])
        tail_loss = p - q_f32 * s

    if rows_valid < sub_mult:
        # Tiny input: per-step Pallas overhead dominates; plain jnp is faster.
        if bulk:
            p, s = _jnp_loss_terms(o[:bulk], t[:bulk])
            tail_loss = tail_loss + p - q_f32 * s
        return tail_loss

    # Static tile geometry: biggest lane-dense block <= 2 MiB per input,
    # rounded down to the dtype-dependent sublane multiple and <= rows_valid
    # so the last (partial) block always starts inside the array.
    tile_cap = max(sub_mult, _round_down(BLOCK_BYTES // (LANES * itemsize), sub_mult))
    tile_m = min(tile_cap, _round_down(rows_valid, sub_mult))
    steps = pl.cdiv(rows_valid, tile_m)
    needs_mask = (steps * tile_m != rows_valid)

    o2 = (o[:bulk] if rem else o).reshape(rows_valid, LANES)
    t2 = (t[:bulk] if rem else t).reshape(rows_valid, LANES)
    q_arr = q_f32.reshape(1)

    cost = pl.CostEstimate(
        flops=4 * bulk,
        transcendentals=0,
        bytes_accessed=bulk * (jnp.dtype(o.dtype).itemsize
                               + jnp.dtype(t.dtype).itemsize) + 8,
    )

    # NOTE: on v7x (2 TensorCores/chip) the reduction could additionally be
    # sharded across cores with pltpu.CORE_PARALLEL / pl.core_map; plain
    # "parallel" does not change codegen, so single-core streaming is used
    # here for portability across v5e/v6e/v7x.
    kernel_loss = pl.pallas_call(
        _make_kernel(tile_m, rows_valid, needs_mask),
        out_shape=jax.ShapeDtypeStruct((1,), jnp.float32),
        grid_spec=pltpu.PrefetchScalarGridSpec(
            num_scalar_prefetch=0,
            grid=(steps,),
            in_specs=[
                pl.BlockSpec((tile_m, LANES), lambda i: (i, 0)),
                pl.BlockSpec((tile_m, LANES), lambda i: (i, 0)),
                pl.BlockSpec(memory_space=pltpu.MemorySpace.SMEM),  # q scalar
            ],
            out_specs=pl.BlockSpec(memory_space=pltpu.MemorySpace.SMEM),
            scratch_shapes=[
                pltpu.VMEM((SUBLANES, LANES), jnp.float32),  # sum(relu(res)) partial
                pltpu.VMEM((SUBLANES, LANES), jnp.float32),  # sum(res) partial
            ],
        ),
        compiler_params=pltpu.CompilerParams(
            dimension_semantics=("arbitrary",),
            vmem_limit_bytes=32 * 1024 * 1024,
        ),
        cost_estimate=cost,
    )(o2, t2, q_arr)

    return kernel_loss[0] + tail_loss


def _reference_loss(output, target, q):
    res = output.astype(jnp.float32) - target.astype(jnp.float32)
    pos = jnp.sum(jnp.where(res > 0, res, 0.0))
    neg = jnp.sum(jnp.where(res < 0, res, 0.0))
    return (1.0 - q) * pos - q * neg


if __name__ == "__main__":
    key = jax.random.PRNGKey(0)
    k1, k2, k3, k4 = jax.random.split(key, 4)
    q = 0.7

    # Case 1: module-scale input (batch=2, channels=4, 16x16); n = 2048 (lane-aligned).
    shape = (2, 4, 16, 16)
    output = jax.random.normal(k1, shape, dtype=jnp.float32)
    target = jax.random.normal(k2, shape, dtype=jnp.float32)
    loss = jax.block_until_ready(custom_loss(output, target, q))
    ref = _reference_loss(output, target, q)
    assert jnp.allclose(loss, ref, rtol=1e-5, atol=1e-5), (loss, ref)

    # Case 2: ragged size exercising the no-pad masked last block + jnp tail.
    shape2 = (5, 17, 31)  # 2635 elements: 20 full 128-lane rows + 75-element tail
    output2 = jax.random.normal(k3, shape2, dtype=jnp.float32)
    target2 = jax.random.normal(k4, shape2, dtype=jnp.float32)
    loss2 = jax.block_until_ready(custom_loss(output2, target2, q))
    ref2 = _reference_loss(output2, target2, q)
    assert jnp.allclose(loss2, ref2, rtol=1e-5, atol=1e-5), (loss2, ref2)

    print("KERNEL_OK")
</pallas_src>

<mosaic_0001>
module attributes {stable_mosaic.version = 11 : i64} {
  func.func @kernel(%arg0: i32, %arg1: memref<16x128xf32, #tpu.memory_space<vmem>>, %arg2: memref<16x128xf32, #tpu.memory_space<vmem>>, %arg3: memref<1xf32, #tpu.memory_space<smem>>, %arg4: memref<1xf32, #tpu.memory_space<smem>>, %arg5: memref<8x128xf32, #tpu.memory_space<vmem>>, %arg6: memref<8x128xf32, #tpu.memory_space<vmem>>) attributes {dimension_semantics = [#tpu.dimension_semantics<arbitrary>], iteration_bounds = array<i64: 1>, scalar_prefetch = 0 : i64, scratch_operands = 2 : i64, tpu.core_type = #tpu.core_type<tc>, window_params = [{transform_indices = @transform_0, window_bounds = array<i64: 16, 128>}, {transform_indices = @transform_1, window_bounds = array<i64: 16, 128>}, {transform_indices = @transform_2, window_bounds = array<i64: 1>}, {transform_indices = @transform_3, window_bounds = array<i64: 1>}]} {
    %c0_i32 = arith.constant 0 : i32
    %0 = arith.cmpi eq, %arg0, %c0_i32 : i32
    %1 = arith.extui %0 : i1 to i32
    %c0_i32_0 = arith.constant 0 : i32
    %2 = arith.cmpi ne, %1, %c0_i32_0 : i32
    scf.if %2 {
      %cst_16 = arith.constant 0.000000e+00 : f32
      %21 = vector.broadcast %cst_16 : f32 to vector<8x128xf32>
      %c0_17 = arith.constant 0 : index
      %c0_18 = arith.constant 0 : index
      %22 = vector.load %arg5[%c0_17, %c0_18] : memref<8x128xf32, #tpu.memory_space<vmem>>, vector<8x128xf32>
      tpu.vector_store %arg5[%c0_17, %c0_18], %21 {strides = array<i32>} : memref<8x128xf32, #tpu.memory_space<vmem>>, vector<8x128xf32>,
      %cst_19 = arith.constant 0.000000e+00 : f32
      %23 = vector.broadcast %cst_19 : f32 to vector<8x128xf32>
      %c0_20 = arith.constant 0 : index
      %c0_21 = arith.constant 0 : index
      %24 = vector.load %arg6[%c0_20, %c0_21] : memref<8x128xf32, #tpu.memory_space<vmem>>, vector<8x128xf32>
      tpu.vector_store %arg6[%c0_20, %c0_21], %23 {strides = array<i32>} : memref<8x128xf32, #tpu.memory_space<vmem>>, vector<8x128xf32>,
    } else {
    }
    %c0 = arith.constant 0 : index
    %c0_1 = arith.constant 0 : index
    %3 = vector.load %arg1[%c0, %c0_1] : memref<16x128xf32, #tpu.memory_space<vmem>>, vector<16x128xf32>
    %c0_2 = arith.constant 0 : index
    %c0_3 = arith.constant 0 : index
    %4 = vector.load %arg2[%c0_2, %c0_3] : memref<16x128xf32, #tpu.memory_space<vmem>>, vector<16x128xf32>
    %5 = arith.subf %3, %4 : vector<16x128xf32>
    %cst = arith.constant 0.000000e+00 : f32
    %6 = vector.broadcast %cst : f32 to vector<16x128xf32>
    %7 = arith.maximumf %5, %6 : vector<16x128xf32>
    %c0_4 = arith.constant 0 : index
    %c0_5 = arith.constant 0 : index
    %8 = vector.load %arg5[%c0_4, %c0_5] : memref<8x128xf32, #tpu.memory_space<vmem>>, vector<8x128xf32>
    %9 = vector.shape_cast %7 : vector<16x128xf32> to vector<2x8x128xf32>
    %cst_6 = arith.constant dense<0.000000e+00> : vector<8x128xf32>
    %10 = vector.multi_reduction <add>, %9, %cst_6 [0] : vector<2x8x128xf32> to vector<8x128xf32>
    %11 = arith.addf %8, %10 : vector<8x128xf32>
    %c0_7 = arith.constant 0 : index
    %c0_8 = arith.constant 0 : index
    %12 = vector.load %arg5[%c0_7, %c0_8] : memref<8x128xf32, #tpu.memory_space<vmem>>, vector<8x128xf32>
    tpu.vector_store %arg5[%c0_7, %c0_8], %11 {strides = array<i32>} : memref<8x128xf32, #tpu.memory_space<vmem>>, vector<8x128xf32>,
    %c0_9 = arith.constant 0 : index
    %c0_10 = arith.constant 0 : index
    %13 = vector.load %arg6[%c0_9, %c0_10] : memref<8x128xf32, #tpu.memory_space<vmem>>, vector<8x128xf32>
    %14 = vector.shape_cast %5 : vector<16x128xf32> to vector<2x8x128xf32>
    %cst_11 = arith.constant dense<0.000000e+00> : vector<8x128xf32>
    %15 = vector.multi_reduction <add>, %14, %cst_11 [0] : vector<2x8x128xf32> to vector<8x128xf32>
    %16 = arith.addf %13, %15 : vector<8x128xf32>
    %c0_12 = arith.constant 0 : index
    %c0_13 = arith.constant 0 : index
    %17 = vector.load %arg6[%c0_12, %c0_13] : memref<8x128xf32, #tpu.memory_space<vmem>>, vector<8x128xf32>
    tpu.vector_store %arg6[%c0_12, %c0_13], %16 {strides = array<i32>} : memref<8x128xf32, #tpu.memory_space<vmem>>, vector<8x128xf32>,
    %c0_i32_14 = arith.constant 0 : i32
    %18 = arith.cmpi eq, %arg0, %c0_i32_14 : i32
    %19 = arith.extui %18 : i1 to i32
    %c0_i32_15 = arith.constant 0 : i32
    %20 = arith.cmpi ne, %19, %c0_i32_15 : i32
    scf.if %20 {
      %c0_16 = arith.constant 0 : index
      %21 = memref.load %arg3[%c0_16] : memref<1xf32, #tpu.memory_space<smem>>
      %c0_17 = arith.constant 0 : index
      %c0_18 = arith.constant 0 : index
      %22 = vector.load %arg5[%c0_17, %c0_18] : memref<8x128xf32, #tpu.memory_space<vmem>>, vector<8x128xf32>
      %23 = vector.shape_cast %22 : vector<8x128xf32> to vector<1x8x128xf32>
      %cst_19 = arith.constant dense<0.000000e+00> : vector<1xf32>
      %24 = vector.multi_reduction <add>, %23, %cst_19 [1, 2] : vector<1x8x128xf32> to vector<1xf32>
      %25 = vector.shape_cast %24 : vector<1xf32> to vector<1x1x1xf32>
      %26 = vector.extract %25[0, 0, 0] : f32 from vector<1x1x1xf32>
      %c0_20 = arith.constant 0 : index
      %c0_21 = arith.constant 0 : index
      %27 = vector.load %arg6[%c0_20, %c0_21] : memref<8x128xf32, #tpu.memory_space<vmem>>, vector<8x128xf32>
      %28 = vector.shape_cast %27 : vector<8x128xf32> to vector<1x8x128xf32>
      %cst_22 = arith.constant dense<0.000000e+00> : vector<1xf32>
      %29 = vector.multi_reduction <add>, %28, %cst_22 [1, 2] : vector<1x8x128xf32> to vector<1xf32>
      %30 = vector.shape_cast %29 : vector<1xf32> to vector<1x1x1xf32>
      %31 = vector.extract %30[0, 0, 0] : f32 from vector<1x1x1xf32>
      %32 = arith.mulf %21, %31 : f32
      %33 = arith.subf %26, %32 : f32
      %c0_23 = arith.constant 0 : index
      %34 = memref.load %arg4[%c0_23] : memref<1xf32, #tpu.memory_space<smem>>
      memref.store %33, %arg4[%c0_23] : memref<1xf32, #tpu.memory_space<smem>>
    } else {
    }
    return
  }
  func.func @transform_0(%arg0: i32) -> (i32, i32) {
    %c0_i32 = arith.constant 0 : i32
    %c0_i32_0 = arith.constant 0 : i32
    return %arg0, %c0_i32 : i32, i32
  }
  func.func @transform_1(%arg0: i32) -> (i32, i32) {
    %c0_i32 = arith.constant 0 : i32
    %c0_i32_0 = arith.constant 0 : i32
    return %arg0, %c0_i32 : i32, i32
  }
  func.func @transform_2(%arg0: i32) -> i32 {
    %c0_i32 = arith.constant 0 : i32
    %c0_i32_0 = arith.constant 0 : i32
    return %c0_i32 : i32
  }
  func.func @transform_3(%arg0: i32) -> i32 {
    %c0_i32 = arith.constant 0 : i32
    %c0_i32_0 = arith.constant 0 : i32
    return %c0_i32 : i32
  }
}

</mosaic_0001>

<bundles_post_ra>
// kernel: tpu_custom_call.1
= control target key start
LH: loop header
LB: loop body
LE: loop exit
PB: predicated region body
PF: predicated region fallthrough
CT: control target
= control target key end

     0   :  { %9 = vsyncpa [#allocation6], 0  ;;  %s242_s0 = inlined_call_operand.hbm [shape: f32[16,128], index: 0, kind: input, shape index: {}]   ;;  %s243_s1 = inlined_call_operand.hbm [shape: f32[16,128], index: 1, kind: input, shape index: {}]   ;;  %s244_s2 = inlined_call_operand.<no memory space> [shape: f32[1], index: 2, kind: input, shape index: {}]   ;;  %s245_s3 = inlined_call_operand.hbm [shape: f32[1], index: 3, kind: output, shape index: {}]  }
   0x1   :  { %10 = vsyncpa [#allocation9], 0 }
   0x2   :  { %11 = vsyncpa [#allocation7], 0  ;;  %s178_s12 = smov [#allocation5]   ;;  %s118_s16 = scalar_lea.hbm %s242_s0, 256 }
   0x3   :  { %s17_s13 = sshll.u32 %s178_s12, 4  ;;  %p119_p0 = scmp.ne.s32.totalorder %s242_s0, %s118_s16  ;;  %s18_s13 = int_to_ptr.vmem [resolvable:$true] %s17_s13 }
   0x4   :  { %p122_p1 = scmp.lt.u32.totalorder %s118_s16, %s242_s0 }
   0x6   :  { %p124_p2 = pnand %p122_p1, %p119_p0 }
   0x8   :  { %127 = shalt.err (!%p124_p2)
}
   0x9   :  { %s128_s21 = scalar_lea.vmem %s18_s13, 256  ;;  %p133_p4 = scmp.lt.s32.totalorder %s18_s13, %s18_s13 }
   0xa   :  { %p129_p3 = scmp.ne.s32.totalorder %s18_s13, %s128_s21  ;;  %p134_p5 = scmp.lt.s32.totalorder %s128_s21, %s128_s21 }
   0xc   :  { %p135_p6 = por %p134_p5, %p133_p4 }
   0xe   :  { %p136_p7 = pnand %p135_p6, %p129_p3 }
  0x10   :  { %139 = shalt.err (!%p136_p7)
}
  0x11   :  { %s179_s22 = smov 128   ;;  %s180_s23 = smov 8  }
  0x12   :  { %23 = dma.hbm_to_vmem [thread:$0]  %s242_s0, 256, %s18_s13, [#allocation6], %s179_s22, %s179_s22, %s180_s23  }
  0x13   :  { %s181_s26 = smov [#allocation8]   ;;  %s140_s30 = scalar_lea.hbm %s243_s1, 256 }
  0x14   :  { %s29_s27 = sshll.u32 %s181_s26, 4  ;;  %p141_p8 = scmp.ne.s32.totalorder %s243_s1, %s140_s30  ;;  %s30_s27 = int_to_ptr.vmem [resolvable:$true] %s29_s27 }
  0x15   :  { %p144_p9 = scmp.lt.u32.totalorder %s140_s30, %s243_s1 }
  0x17   :  { %p146_p10 = pnand %p144_p9, %p141_p8 }
  0x19   :  { %149 = shalt.err (!%p146_p10)
}
  0x1a   :  { %s150_s8 = scalar_lea.vmem %s30_s27, 256  ;;  %p155_p12 = scmp.lt.s32.totalorder %s30_s27, %s30_s27 }
  0x1b   :  { %p151_p11 = scmp.ne.s32.totalorder %s30_s27, %s150_s8  ;;  %p156_p13 = scmp.lt.s32.totalorder %s150_s8, %s150_s8 }
  0x1d   :  { %p157_p0 = por %p156_p13, %p155_p12 }
  0x1f   :  { %p158_p1 = pnand %p157_p0, %p151_p11 }
  0x21   :  { %161 = shalt.err (!%p158_p1)
}
  0x22   :  { %35 = dma.hbm_to_vmem [thread:$0]  %s243_s1, 256, %s30_s27, [#allocation9], %s179_s22, %s179_s22, %s180_s23  }
  0x23   :  { %172 = dma.done.wait [#allocation6], 256  }
  0x24   :  { %173 = vsyncadd [#allocation6], 4294967040 }
  0x25   :  { %174 = dma.done.wait [#allocation9], 256  }
  0x26   :  { %175 = vsyncadd [#allocation9], 4294967040  ;;  %v50_v0 = vld [vmem:[#allocation5] sm:$0xff]  ;;  %v51_v1 = vld [vmem:[#allocation5 + $0x8] sm:$0xff]  ;;  %s162_s17 = scalar_lea.hbm %s245_s3, 16 }
  0x27   :  { %v52_v2 = vld [vmem:[#allocation8] sm:$0xff]  ;;  %v53_v3 = vld [vmem:[#allocation8 + $0x8] sm:$0xff]  ;;  %p163_p2 = scmp.ne.s32.totalorder %s245_s3, %s162_s17  ;;  %p166_p3 = scmp.lt.u32.totalorder %s162_s17, %s245_s3 }
  0x28   :  { %v54_v4 = vsub.f32 %v50_v0, %v52_v2  ;;  %v55_v5 = vsub.f32 %v51_v1, %v53_v3 }
  0x29   :  { %p168_p4 = pnand %p166_p3, %p163_p2 }
  0x2a   :  { %v56_v6 = vmax.f32 %v54_v4, 0.0  ;;  %v57_v7 = vmax.f32 %v55_v5, 0.0  ;;  %v63_v9 = vadd.f32 %v55_v5, %v54_v4 }
  0x2c   :  { %v59_v8 = vadd.f32 %v57_v7, %v56_v6 }
  0x2e   :  { %71 = vadd.xlane.f32.xlu0 %v59_v8 }
  0x32   :  { %81 = vadd.xlane.f32.xlu0 %v63_v9 }
  0xbb   :  { %v72_v10 = vpop.xlane.xlu0 %71 }
  0xbc   :  { %v73_v11 = vrot.slane %v72_v10, 4 }
  0xbe   :  { %v74_v12 = vadd.f32 %v73_v11, %v72_v10 }
  0xbf   :  { %v82_v13 = vpop.xlane.xlu0 %81 }
  0xc0   :  { %v75_v14 = vrot.slane %v74_v12, 2  ;;  %v83_v15 = vrot.slane %v82_v13, 4 }
  0xc2   :  { %v84_v16 = vadd.f32 %v83_v15, %v82_v13  ;;  %v76_v17 = vadd.f32 %v75_v14, %v74_v12 }
  0xc4   :  { %v85_v18 = vrot.slane %v84_v16, 2  ;;  %v77_v19 = vrot.slane %v76_v17, 1 }
  0xc6   :  { %v86_v20 = vadd.f32 %v85_v18, %v84_v16  ;;  %v78_v21 = vadd.f32 %v77_v19, %v76_v17 }
  0xc8   :  { %109 = vpush %v78_v21  ;;  %v87_v22 = vrot.slane %v86_v20, 1 }
  0xca   :  { %v88_v23 = vadd.f32 %v87_v22, %v86_v20 }
  0xcc   :  { %111 = vpush %v88_v23 }
  0xf9   :  { %s110_s1 = spop %109 }
  0xfd   :  { %s112_s10 = spop %111 }
  0xfe   :  { %s90_s13 = smul.f32 %s112_s10, %s244_s2 }
 0x100   :  { %s91_s14 = ssub.f32 %s110_s1, %s90_s13 }
 0x102   :  { %93 = sst [smem:[#allocation10]] %s91_s14 }
 0x103   :  { %171 = shalt.err (!%p168_p4)
}
 0x104   :  { %s182_s22 = smov [#allocation10]  }
 0x105   :  { %101 = dma.smem_to_hbm %s182_s22, 16, %s245_s3, [#allocation7]  }
 0x106   :  { %176 = dma.done.wait [#allocation7], 16  }
 0x107   :  { %177 = vsyncadd [#allocation7], 4294967280 }
 0x108   :  { %105 = sfence }
 0x109   :  { %106 = vsyncpa [#allocation6], 1 }
 0x10a   :  { %107 = vsyncpa [#allocation9], 1 }
 0x10b   :  { %108 = vsyncpa [#allocation7], 1 }

</bundles_post_ra>
